<compile_context>
chip_gen: v7x
topology: tpu7x:2x2x1
jax: 0.10.0
libtpu: 0.0.40
codegen_flags: <defaults>
</compile_context>

<pallas_src>
import jax
import jax.numpy as jnp
from jax.experimental import pallas as pl
from jax.experimental.pallas import tpu as pltpu

STATE_DIM = 3        # pendulum observation: (cos theta, sin theta, theta_dot)
ACTION_DIM = 1
ACTION_RANGE = 2.5
H1 = 64
H2 = 32

# --- packed weight slab layout (single f32 (80, 128) VMEM-resident buffer) ---
SLAB_ROWS = 80
SLAB_COLS = 128
ROW_W1 = 0     # rows 0..2  : w1 (STATE_DIM, H1)              in cols [0, H1)
ROW_B1 = 3     # row  3     : b1                              in cols [0, H1)
ROW_W3T = 4    # row  4     : w3^T (since ACTION_DIM == 1)    in cols [0, H2)
ROW_B3 = 5     # row  5     : b3                              in cols [0, ACTION_DIM)
ROW_B2 = 6     # row  6     : b2                              in cols [0, H2)
ROW_W2 = 8     # rows 8..71 : w2 (H1, H2), sublane-aligned    in cols [0, H2)


def _round_up(x, m):
    return (x + m - 1) // m * m


def pack_params(w1, b1, w2, b2, w3, b3):
    """Pack all weights/biases into one lane-aligned f32 slab (one DMA)."""
    slab = jnp.zeros((SLAB_ROWS, SLAB_COLS), jnp.float32)
    slab = slab.at[ROW_W1:ROW_W1 + STATE_DIM, 0:H1].set(w1)
    slab = slab.at[ROW_B1, 0:H1].set(b1.reshape(H1))
    slab = slab.at[ROW_W3T, 0:H2].set(w3.reshape(H2))            # ACTION_DIM == 1
    slab = slab.at[ROW_B3, 0:ACTION_DIM].set(b3.reshape(ACTION_DIM))
    slab = slab.at[ROW_B2, 0:H2].set(b2.reshape(H2))
    slab = slab.at[ROW_W2:ROW_W2 + H1, 0:H2].set(w2)
    return slab


def actor_kernel(x_ref, slab_ref, o_ref):
    x = x_ref[...]                                               # (TB, STATE_DIM) f32

    # fc1 + relu on the VPU: K=3 is far too small for the MXU; three broadcast
    # FMAs use otherwise-idle VALU slots and skip an MXU push/pop round trip.
    a1 = (x[:, 0:1] * slab_ref[ROW_W1 + 0:ROW_W1 + 1, 0:H1]
          + x[:, 1:2] * slab_ref[ROW_W1 + 1:ROW_W1 + 2, 0:H1]
          + x[:, 2:3] * slab_ref[ROW_W1 + 2:ROW_W1 + 3, 0:H1]
          + slab_ref[ROW_B1:ROW_B1 + 1, 0:H1])
    a1 = jnp.maximum(a1, 0.0)                                    # (TB, H1)

    # fc2 + relu on the MXU.
    a2 = jnp.dot(a1, slab_ref[ROW_W2:ROW_W2 + H1, 0:H2],
                 preferred_element_type=jnp.float32)
    a2 = jnp.maximum(a2 + slab_ref[ROW_B2:ROW_B2 + 1, 0:H2], 0.0)  # (TB, H2)

    # fc3 (N = ACTION_DIM = 1): VPU multiply + lane reduction instead of a
    # 1-lane-wide MXU matmul.
    a3 = jnp.sum(a2 * slab_ref[ROW_W3T:ROW_W3T + 1, 0:H2],
                 axis=-1, keepdims=True)
    a3 = a3 + slab_ref[ROW_B3:ROW_B3 + 1, 0:ACTION_DIM]          # (TB, ACTION_DIM)

    o_ref[...] = (jnp.tanh(a3) * ACTION_RANGE).astype(o_ref.dtype)


def actor_forward(state, slab, *, tile_b=256):
    """state: (B, STATE_DIM) f32; slab: packed (SLAB_ROWS, SLAB_COLS) f32 weights."""
    B = state.shape[0]
    TB = min(_round_up(tile_b, 8), _round_up(B, 8))
    B_pad = _round_up(B, TB)
    if B_pad != B:
        state = jnp.pad(state, ((0, B_pad - B), (0, 0)))

    out = pl.pallas_call(
        actor_kernel,
        out_shape=jax.ShapeDtypeStruct((B_pad, ACTION_DIM), jnp.float32),
        grid_spec=pltpu.PrefetchScalarGridSpec(
            num_scalar_prefetch=0,
            grid=(B_pad // TB,),
            in_specs=[
                pl.BlockSpec((TB, STATE_DIM), lambda i: (i, 0)),
                # Constant block index -> weights stay resident in VMEM.
                pl.BlockSpec((SLAB_ROWS, SLAB_COLS), lambda i: (0, 0)),
            ],
            out_specs=pl.BlockSpec((TB, ACTION_DIM), lambda i: (i, 0)),
        ),
        # Batch axis is embarrassingly parallel -> megacore sharding on v7x.
        compiler_params=pltpu.CompilerParams(
            dimension_semantics=("parallel",)),
    )(state, slab)
    return out[:B] if B_pad != B else out


def init_params(key):
    """Deterministic init mimicking nn.Linear's U(-1/sqrt(fan_in), 1/sqrt(fan_in))."""
    ks = jax.random.split(key, 6)

    def lin(kw, kb, fan_in, fan_out):
        bound = 1.0 / jnp.sqrt(jnp.float32(fan_in))
        w = jax.random.uniform(kw, (fan_in, fan_out), jnp.float32, -bound, bound)
        b = jax.random.uniform(kb, (1, fan_out), jnp.float32, -bound, bound)
        return w, b

    w1, b1 = lin(ks[0], ks[1], STATE_DIM, H1)
    w2, b2 = lin(ks[2], ks[3], H1, H2)
    w3, b3 = lin(ks[4], ks[5], H2, ACTION_DIM)
    return {"w1": w1, "b1": b1, "w2": w2, "b2": b2, "w3": w3, "b3": b3}


def actor_reference(state, params):
    a = jnp.maximum(state @ params["w1"] + params["b1"], 0.0)
    a = jnp.maximum(a @ params["w2"] + params["b2"], 0.0)
    return jnp.tanh(a @ params["w3"] + params["b3"]) * ACTION_RANGE


if __name__ == "__main__":
    key = jax.random.PRNGKey(0)
    k_params, k_state = jax.random.split(key)
    params = init_params(k_params)
    slab = pack_params(params["w1"], params["b1"], params["w2"],
                       params["b2"], params["w3"], params["b3"])

    # Small (deployment-style) batch: single grid step.
    batch = 8
    state = jax.random.normal(k_state, (batch, STATE_DIM), jnp.float32)
    out = jax.block_until_ready(actor_forward(state, slab))
    ref = actor_reference(state, params)
    assert out.shape == (batch, ACTION_DIM)
    assert jnp.allclose(out, ref, atol=5e-5, rtol=1e-5), (out, ref)

    # Larger, non-multiple-of-tile batch: exercises batch tiling + padding.
    batch2 = 300
    state2 = jax.random.normal(jax.random.PRNGKey(1), (batch2, STATE_DIM),
                               jnp.float32)
    out2 = jax.block_until_ready(actor_forward(state2, slab, tile_b=128))
    ref2 = actor_reference(state2, params)
    assert out2.shape == (batch2, ACTION_DIM)
    assert jnp.allclose(out2, ref2, atol=5e-5, rtol=1e-5)

    print("KERNEL_OK")
</pallas_src>

<mosaic_0001>
module attributes {stable_mosaic.version = 11 : i64} {
  func.func @actor_kernel(%arg0: i32, %arg1: memref<8x3xf32, #tpu.memory_space<vmem>>, %arg2: memref<80x128xf32, #tpu.memory_space<vmem>>, %arg3: memref<8x1xf32, #tpu.memory_space<vmem>>) attributes {dimension_semantics = [#tpu.dimension_semantics<parallel>], iteration_bounds = array<i64: 1>, scalar_prefetch = 0 : i64, scratch_operands = 0 : i64, tpu.core_type = #tpu.core_type<tc>, window_params = [{transform_indices = @transform_0, window_bounds = array<i64: 8, 3>}, {pipeline_mode = #tpu.pipeline_mode<synchronous>, transform_indices = @transform_1, window_bounds = array<i64: 80, 128>}, {transform_indices = @transform_2, window_bounds = array<i64: 8, 1>}]} {
    %c0 = arith.constant 0 : index
    %c0_0 = arith.constant 0 : index
    %0 = vector.load %arg1[%c0, %c0_0] : memref<8x3xf32, #tpu.memory_space<vmem>>, vector<8x3xf32>
    %1 = vector.extract_strided_slice %0 {offsets = [0, 0], sizes = [8, 1], strides = [1, 1]} : vector<8x3xf32> to vector<8x1xf32>
    %c0_1 = arith.constant 0 : index
    %c0_2 = arith.constant 0 : index
    %2 = vector.load %arg2[%c0_1, %c0_2] : memref<80x128xf32, #tpu.memory_space<vmem>>, vector<1x64xf32>
    %3 = vector.broadcast %1 : vector<8x1xf32> to vector<8x64xf32>
    %4 = vector.broadcast %2 : vector<1x64xf32> to vector<8x64xf32>
    %5 = arith.mulf %3, %4 : vector<8x64xf32>
    %6 = vector.extract_strided_slice %0 {offsets = [0, 1], sizes = [8, 1], strides = [1, 1]} : vector<8x3xf32> to vector<8x1xf32>
    %c1 = arith.constant 1 : index
    %c0_3 = arith.constant 0 : index
    %7 = vector.load %arg2[%c1, %c0_3] : memref<80x128xf32, #tpu.memory_space<vmem>>, vector<1x64xf32>
    %8 = vector.broadcast %6 : vector<8x1xf32> to vector<8x64xf32>
    %9 = vector.broadcast %7 : vector<1x64xf32> to vector<8x64xf32>
    %10 = arith.mulf %8, %9 : vector<8x64xf32>
    %11 = arith.addf %5, %10 : vector<8x64xf32>
    %12 = vector.extract_strided_slice %0 {offsets = [0, 2], sizes = [8, 1], strides = [1, 1]} : vector<8x3xf32> to vector<8x1xf32>
    %c2 = arith.constant 2 : index
    %c0_4 = arith.constant 0 : index
    %13 = vector.load %arg2[%c2, %c0_4] : memref<80x128xf32, #tpu.memory_space<vmem>>, vector<1x64xf32>
    %14 = vector.broadcast %12 : vector<8x1xf32> to vector<8x64xf32>
    %15 = vector.broadcast %13 : vector<1x64xf32> to vector<8x64xf32>
    %16 = arith.mulf %14, %15 : vector<8x64xf32>
    %17 = arith.addf %11, %16 : vector<8x64xf32>
    %c3 = arith.constant 3 : index
    %c0_5 = arith.constant 0 : index
    %18 = vector.load %arg2[%c3, %c0_5] : memref<80x128xf32, #tpu.memory_space<vmem>>, vector<1x64xf32>
    %19 = vector.broadcast %18 : vector<1x64xf32> to vector<8x64xf32>
    %20 = arith.addf %17, %19 : vector<8x64xf32>
    %cst = arith.constant 0.000000e+00 : f32
    %21 = vector.broadcast %cst : f32 to vector<8x64xf32>
    %22 = arith.maximumf %20, %21 : vector<8x64xf32>
    %c8 = arith.constant 8 : index
    %c0_6 = arith.constant 0 : index
    %23 = vector.load %arg2[%c8, %c0_6] : memref<80x128xf32, #tpu.memory_space<vmem>>, vector<64x32xf32>
    %cst_7 = arith.constant dense<0.000000e+00> : vector<8x32xf32>
    %24 = tpu.matmul %22, %23, %cst_7 {dimension_numbers = #tpu.dot_dimension_numbers<[1], [0], [0], [1], [0, 0, 1, 1], [], []>} : vector<8x64xf32>, vector<64x32xf32>, vector<8x32xf32> -> vector<8x32xf32>
    %c6 = arith.constant 6 : index
    %c0_8 = arith.constant 0 : index
    %25 = vector.load %arg2[%c6, %c0_8] : memref<80x128xf32, #tpu.memory_space<vmem>>, vector<1x32xf32>
    %26 = vector.broadcast %25 : vector<1x32xf32> to vector<8x32xf32>
    %27 = arith.addf %24, %26 : vector<8x32xf32>
    %cst_9 = arith.constant 0.000000e+00 : f32
    %28 = vector.broadcast %cst_9 : f32 to vector<8x32xf32>
    %29 = arith.maximumf %27, %28 : vector<8x32xf32>
    %c4 = arith.constant 4 : index
    %c0_10 = arith.constant 0 : index
    %30 = vector.load %arg2[%c4, %c0_10] : memref<80x128xf32, #tpu.memory_space<vmem>>, vector<1x32xf32>
    %31 = vector.broadcast %30 : vector<1x32xf32> to vector<8x32xf32>
    %32 = arith.mulf %29, %31 : vector<8x32xf32>
    %cst_11 = arith.constant dense<0.000000e+00> : vector<8xf32>
    %33 = vector.multi_reduction <add>, %32, %cst_11 [1] : vector<8x32xf32> to vector<8xf32>
    %34 = vector.shape_cast %33 : vector<8xf32> to vector<8x1xf32>
    %c5 = arith.constant 5 : index
    %c0_12 = arith.constant 0 : index
    %35 = vector.load %arg2[%c5, %c0_12] : memref<80x128xf32, #tpu.memory_space<vmem>>, vector<1x1xf32>
    %36 = vector.broadcast %35 : vector<1x1xf32> to vector<8x1xf32>
    %37 = arith.addf %34, %36 : vector<8x1xf32>
    %38 = math.tanh %37 : vector<8x1xf32>
    %cst_13 = arith.constant 2.500000e+00 : f32
    %39 = vector.broadcast %cst_13 : f32 to vector<8x1xf32>
    %40 = arith.mulf %38, %39 : vector<8x1xf32>
    %c0_14 = arith.constant 0 : index
    %c0_15 = arith.constant 0 : index
    %41 = vector.load %arg3[%c0_14, %c0_15] : memref<8x1xf32, #tpu.memory_space<vmem>>, vector<8x1xf32>
    tpu.vector_store %arg3[%c0_14, %c0_15], %40 {strides = array<i32>} : memref<8x1xf32, #tpu.memory_space<vmem>>, vector<8x1xf32>,
    return
  }
  func.func @transform_0(%arg0: i32) -> (i32, i32) {
    %c0_i32 = arith.constant 0 : i32
    %c0_i32_0 = arith.constant 0 : i32
    return %arg0, %c0_i32 : i32, i32
  }
  func.func @transform_1(%arg0: i32) -> (i32, i32) {
    %c0_i32 = arith.constant 0 : i32
    %c0_i32_0 = arith.constant 0 : i32
    %c0_i32_1 = arith.constant 0 : i32
    return %c0_i32, %c0_i32_0 : i32, i32
  }
  func.func @transform_2(%arg0: i32) -> (i32, i32) {
    %c0_i32 = arith.constant 0 : i32
    %c0_i32_0 = arith.constant 0 : i32
    return %arg0, %c0_i32 : i32, i32
  }
}

</mosaic_0001>

<bundles_post_ra>
// kernel: tpu_custom_call.1
= control target key start
LH: loop header
LB: loop body
LE: loop exit
PB: predicated region body
PF: predicated region fallthrough
CT: control target
= control target key end

     0   :  { %7 = vsyncpa [#allocation3], 0  ;;  %s266_s9 = smov [#allocation2]   ;;  %s308_s0 = inlined_call_operand.vmem [shape: f32[8,3], index: 0, kind: input, shape index: {}]   ;;  %s309_s1 = inlined_call_operand.hbm [shape: f32[80,128], index: 1, kind: input, shape index: {}]   ;;  %s310_s2 = inlined_call_operand.vmem [shape: f32[8,1], index: 2, kind: output, shape index: {}]  }
   0x1   :  { %s15_s10 = sshll.u32 %s266_s9, 4  ;;  %s242_s13 = scalar_lea.hbm %s309_s1, 1280  ;;  %s16_s10 = int_to_ptr.vmem [resolvable:$true] %s15_s10 }
   0x2   :  { %p243_p0 = scmp.ne.s32.totalorder %s309_s1, %s242_s13  ;;  %p246_p1 = scmp.lt.u32.totalorder %s242_s13, %s309_s1 }
   0x4   :  { %p248_p2 = pnand %p246_p1, %p243_p0 }
   0x6   :  { %251 = shalt.err (!%p248_p2)
}
   0x7   :  { %s252_s18 = scalar_lea.vmem %s16_s10, 1280  ;;  %p257_p4 = scmp.lt.s32.totalorder %s16_s10, %s16_s10 }
   0x8   :  { %p253_p3 = scmp.ne.s32.totalorder %s16_s10, %s252_s18  ;;  %p258_p5 = scmp.lt.s32.totalorder %s252_s18, %s252_s18 }
   0xa   :  { %p259_p6 = por %p258_p5, %p257_p4 }
   0xc   :  { %p260_p7 = pnand %p259_p6, %p253_p3 }
   0xe   :  { %263 = shalt.err (!%p260_p7)
}
   0xf   :  { %s267_s19 = smov 128   ;;  %s268_s20 = smov 8  }
  0x10   :  { %21 = dma.hbm_to_vmem [thread:$0]  %s309_s1, 1280, %s16_s10, [#allocation3], %s267_s19, %s267_s19, %s268_s20  }
  0x11   :  { %264 = dma.done.wait [#allocation3], 1280  }
  0x12   :  { %265 = vsyncadd [#allocation3], 4294966016  ;;  %v269_v0 = vmov 0   ;;  %v270_v1 = vmov 2   ;;  %v271_v2 = vmov 0.0|0.0   ;;  %v25_v3 = vld [vmem:[%s308_s0] sm:$0xff] }
  0x13   :  { %236 = vset.pattern.permute.xlu0 %v269_v0  ;;  %238 = vset.pattern.permute.xlu1 %v270_v1  ;;  %v66_v4 = vld [vmem:[#allocation2 + $0x8] sm:$0xff]  ;;  %v67_v5 = vld [vmem:[#allocation2 + $0x10] sm:$0xff]  ;;  %v68_v6 = vld [vmem:[#allocation2 + $0x18] sm:$0xff]  ;;  %v272_v10 = vmov 1   ;;  %vm273_vm0 = vmmov 0   ;;  %v274_v17 = vmov 0.0  }
  0x14   :  { %215 = vmatprep.subr.bf16.mxu0 %v271_v2  ;;  %29 = vperm.xlu0 %236, %v25_v3   ;;  %v69_v7 = vld [vmem:[#allocation2 + $0x20] sm:$0xff]  ;;  %v216_v8 = vpack.c.bf16 %v67_v5, %v66_v4  ;;  %v70_v11 = vld [vmem:[#allocation2 + $0x28] sm:$0xff]  ;;  %v71_v12 = vld [vmem:[#allocation2 + $0x30] sm:$0xff]  ;;  %vm79_vm1 = vcmask 523264   ;;  %vm160_vm2 = vcmask 261120   ;;  %vm172_vm3 = vcmask 7168  }
  0x15   :  { %50 = vperm.xlu1 %238, %v25_v3   ;;  %v219_v9 = vpack.c.bf16 %v69_v7, %v68_v6  ;;  %v222_v13 = vpack.c.bf16 %v71_v12, %v70_v11  ;;  %v72_v14 = vld [vmem:[#allocation2 + $0x38] sm:$0xff]  ;;  %v73_v15 = vld [vmem:[#allocation2 + $0x40] sm:$0xff]  ;;  %212 = vmatprep.mubr.msk.f32.mxu0 %vm273_vm0, %v274_v17 }
  0x16   :  { %217 = vmatpush3.bf16.msra.mxu0 %v216_v8  ;;  %v225_v16 = vpack.c.bf16 %v73_v15, %v72_v14  ;;  %v179_v19 = vld [vmem:[#allocation2] ss:$0 sm:$0xff]  ;;  %v180_v20 = vld [vmem:[#allocation2 + $0x1] ss:$0 sm:$0xff]  ;;  %v181_v21 = vld [vmem:[#allocation2 + $0x2] ss:$0 sm:$0xff] }
  0x17   :  { %218 = vmatprep.subr.bf16.mxu0 %v271_v2  ;;  %v182_v28 = vld [vmem:[#allocation2 + $0x3] ss:$0 sm:$0xff]  ;;  %v183_v32 = vld [vmem:[#allocation2 + $0x6] ss:$0 sm:$0xff]  ;;  %v185_v36 = vld [vmem:[#allocation2 + $0x4] ss:$0 sm:$0xff] }
  0x18   :  { %237 = vset.pattern.permute.xlu0 %v272_v10  ;;  %v186_v40 = vld [vmem:[#allocation2 + $0x5] ss:$0 sm:$0xff] }
  0x19   :  { %39 = vperm.xlu0 %237, %v25_v3  }
  0x1a   :  { %220 = vmatpush3.bf16.msra.mxu0 %v219_v9 }
  0x1b   :  { %221 = vmatprep.subr.bf16.mxu0 %v271_v2 }
  0x1d   :  { %239 = vset.pattern.permute.xlu0 %v270_v1 }
  0x1e   :  { %223 = vmatpush3.bf16.msra.mxu0 %v222_v13 }
  0x1f   :  { %224 = vmatprep.subr.bf16.mxu0 %v271_v2 }
  0x22   :  { %226 = vmatpush3.bf16.msra.mxu0 %v225_v16 }
  0x93   :  { %v30_v18 = vpop.permute.xlu0 %29 }
  0x94   :  { %v51_v22 = vpop.permute.xlu1 %50  ;;  %v36_v24 = vmul.f32 %v179_v19, %v30_v18 }
  0x95   :  { %v57_v26 = vmul.f32 %v181_v21, %v51_v22 }
  0x98   :  { %v40_v23 = vpop.permute.xlu0 %39 }
  0x99   :  { %v46_v25 = vmul.f32 %v180_v20, %v40_v23 }
  0x9b   :  { %v47_v27 = vadd.f32 %v46_v25, %v36_v24 }
  0x9d   :  { %v58_v29 = vadd.f32 %v57_v26, %v47_v27 }
  0x9f   :  { %v64_v30 = vadd.f32 %v182_v28, %v58_v29 }
  0xa1   :  { %v65_v31 = vmax.f32 %v64_v30, 0.0 }
  0xa3   :  { %213 = vmatmul.mubr.msk.f32.vlgmr.msra.gmra.mrb[0].mxu0 %vm79_vm1, %v65_v31 }
 0x176   :  { %v149_v33 = vpop.f32.mrb[0].mxu0 }
 0x177   :  { %v150_v34 = vadd.f32 %v183_v32, %v149_v33  ;;  %v214_v35 = vpop.f32.mrb[1].mxu0 }
 0x179   :  { %v153_v37 = vmax.f32 %v150_v34, 0.0 }
 0x17b   :  { %v159_v38 = vmul.f32 %v185_v36, %v153_v37 }
 0x17d   :  { %v161_v39 = vsel %vm160_vm2, %v159_v38, 0.0 }
 0x17e   :  { %162 = vadd.xlane.f32.xlu1 %v161_v39 }
 0x20b   :  { %v163_v41 = vpop.xlane.xlu1 %162 }
 0x20c   :  { %v169_v42 = vadd.f32 %v186_v40, %v163_v41 }
 0x20e   :  { %240 = vtanh.f32 %v169_v42 }
 0x218   :  { %v241_v43 = vpop.eup %240 }
 0x219   :  { %v171_v44 = vmul.f32 2.5, %v241_v43 }
 0x21b   :  { %173 = vst.msk [vmem:[%s310_s2] sm:$0xff] %vm172_vm3, %v171_v44 }
 0x21c   :  { %178 = vsyncpa [#allocation3], 1 }

</bundles_post_ra>
